<compile_context>
chip_gen: v7x
topology: tpu7x:2x2x1
jax: 0.10.0
libtpu: 0.0.40
codegen_flags: <defaults>
</compile_context>

<pallas_src>
import jax
import jax.numpy as jnp
from jax.experimental import pallas as pl
from jax.experimental.pallas import tpu as pltpu


# ----------------------------------------------------------------------------
# Kernel
# ----------------------------------------------------------------------------
def _clip_embedding_kernel(tok_ids_ref,     # SMEM (B, S) int32   (scalar prefetch)
                           tok_embed_hbm,   # HBM  (V, D)         (pl.ANY, raw ref)
                           pos_ref,         # VMEM (S, D)         (resident, same every step)
                           o_ref,           # VMEM (1, S, D)      (output tile for batch b)
                           gather_buf,      # VMEM (S, D) scratch (gather destination)
                           sems):           # DMA semaphores, shape (S,)
    b = pl.program_id(0)
    S = gather_buf.shape[0]

    # Kick off all S row-gather DMAs; they overlap with each other (and with the
    # BlockSpec pipeline's own transfers for pos/out).
    @pl.loop(0, S)
    def _start(r):
        tid = tok_ids_ref[b, r]
        pltpu.make_async_copy(
            tok_embed_hbm.at[pl.ds(tid, 1)],   # (1, D) row of the embedding table
            gather_buf.at[pl.ds(r, 1)],        # (1, D) destination row
            sems.at[r],
        ).start()

    # Wait for every row to land.
    @pl.loop(0, S)
    def _wait(r):
        pltpu.make_async_copy(
            tok_embed_hbm.at[pl.ds(0, 1)],     # shape-matching descriptor for wait
            gather_buf.at[pl.ds(r, 1)],
            sems.at[r],
        ).wait()

    # Single vectorized add + lane-dense (S, D) store.
    o_ref[0] = gather_buf[...] + pos_ref[...]


# ----------------------------------------------------------------------------
# Wrapper
# ----------------------------------------------------------------------------
def clip_embedding(tokens, tok_embed, pos_embed):
    """CLIPEmbedding.forward: tok_embed[tokens] + pos_embed (broadcast over batch)."""
    B, S = tokens.shape
    V, D = tok_embed.shape
    assert pos_embed.shape == (S, D), (pos_embed.shape, (S, D))
    tok_ids = tokens.astype(jnp.int32)

    grid_spec = pltpu.PrefetchScalarGridSpec(
        num_scalar_prefetch=1,          # tok_ids -> SMEM, available before the grid runs
        grid=(B,),
        in_specs=[
            # Embedding table: leave in HBM, gather rows manually via DMA.
            pl.BlockSpec(memory_space=pl.ANY),
            # Positional embedding: full (S, D) block, identical for every step.
            pl.BlockSpec((S, D), lambda b, tok: (0, 0)),
        ],
        out_specs=pl.BlockSpec((1, S, D), lambda b, tok: (b, 0, 0)),
        scratch_shapes=[
            pltpu.VMEM((S, D), tok_embed.dtype),   # gather destination
            pltpu.SemaphoreType.DMA((S,)),         # one DMA semaphore per row
        ],
    )

    return pl.pallas_call(
        _clip_embedding_kernel,
        out_shape=jax.ShapeDtypeStruct((B, S, D), tok_embed.dtype),
        grid_spec=grid_spec,
        compiler_params=pltpu.CompilerParams(
            dimension_semantics=("arbitrary",)),
    )(tok_ids, tok_embed, pos_embed)


# ----------------------------------------------------------------------------
if __name__ == "__main__":
    # Small shapes consistent with the module (real CLIP: V=49408, D=768, S=77).
    NUM_VOCAB = 512
    NUM_EMBED = 128
    NUM_TOKEN = 16
    BATCH = 2

    key = jax.random.PRNGKey(0)
    k_tok_w, k_pos, k_ids = jax.random.split(key, 3)

    # nn.Embedding weight (f32) and the positional parameter (zeros in the spec;
    # use small random values here so the correctness check is non-trivial).
    tok_embed = 0.02 * jax.random.normal(k_tok_w, (NUM_VOCAB, NUM_EMBED), jnp.float32)
    pos_embed = 0.01 * jax.random.normal(k_pos, (NUM_TOKEN, NUM_EMBED), jnp.float32)
    tokens = jax.random.randint(k_ids, (BATCH, NUM_TOKEN), 0, NUM_VOCAB, dtype=jnp.int32)

    out = clip_embedding(tokens, tok_embed, pos_embed)
    out = jax.block_until_ready(out)

    # Plain-JAX reference of the PyTorch forward.
    ref = tok_embed[tokens] + pos_embed[None, :, :]

    assert out.shape == (BATCH, NUM_TOKEN, NUM_EMBED)
    assert out.dtype == jnp.float32
    assert bool(jnp.allclose(out, ref, atol=1e-6, rtol=1e-6))
    print("KERNEL_OK")
</pallas_src>

<mosaic_0001>
module attributes {stable_mosaic.version = 11 : i64} {
  func.func @_clip_embedding_kernel(%arg0: i32, %arg1: memref<2x16xi32, #tpu.memory_space<smem>>, %arg2: memref<512x128xf32, #tpu.memory_space<any>>, %arg3: memref<16x128xf32, #tpu.memory_space<vmem>>, %arg4: memref<1x16x128xf32, #tpu.memory_space<vmem>>, %arg5: memref<16x128xf32, #tpu.memory_space<vmem>>, %arg6: memref<16x!tpu.dma_semaphore, #tpu.memory_space<semaphore_mem>>) attributes {dimension_semantics = [#tpu.dimension_semantics<arbitrary>], iteration_bounds = array<i64: 2>, scalar_prefetch = 1 : i64, scratch_operands = 2 : i64, tpu.core_type = #tpu.core_type<tc>, window_params = [{}, {pipeline_mode = #tpu.pipeline_mode<synchronous>, transform_indices = @transform_1, window_bounds = array<i64: 16, 128>}, {transform_indices = @transform_2, window_bounds = array<i64: 1, 16, 128>}]} {
    %c0_i32 = arith.constant 0 : i32
    %c16_i32 = arith.constant 16 : i32
    %0 = arith.addi %c0_i32, %c16_i32 : i32
    %c1_i32 = arith.constant 1 : i32
    scf.for %arg7 = %c0_i32 to %0 step %c1_i32  : i32 {
      %c1_i32_11 = arith.constant 1 : i32
      %8 = arith.muli %arg7, %c1_i32_11 : i32
      %c0_i32_12 = arith.constant 0 : i32
      %9 = arith.addi %c0_i32_12, %8 : i32
      %10 = arith.index_cast %arg0 : i32 to index
      %11 = arith.index_cast %9 : i32 to index
      %12 = memref.load %arg1[%10, %11] : memref<2x16xi32, #tpu.memory_space<smem>>
      %c0_i32_13 = arith.constant 0 : i32
      %13 = tpu.memref_slice %arg2[%12, %c0_i32_13] : memref<512x128xf32, #tpu.memory_space<any>> -> memref<1x128xf32, #tpu.memory_space<any>>
      %c0_i32_14 = arith.constant 0 : i32
      %14 = tpu.memref_slice %arg5[%9, %c0_i32_14] : memref<16x128xf32, #tpu.memory_space<vmem>> -> memref<1x128xf32, #tpu.memory_space<vmem>>
      %15 = tpu.memref_slice %arg6[%9] : memref<16x!tpu.dma_semaphore, #tpu.memory_space<semaphore_mem>> -> memref<1x!tpu.dma_semaphore, #tpu.memory_space<semaphore_mem>>
      %16 = tpu.memref_squeeze %15 : memref<1x!tpu.dma_semaphore, #tpu.memory_space<semaphore_mem>> -> memref<!tpu.dma_semaphore, #tpu.memory_space<semaphore_mem>>
      tpu.enqueue_dma source(%13 : memref<1x128xf32, #tpu.memory_space<any>>) target(%14 : memref<1x128xf32, #tpu.memory_space<vmem>>) target_semaphore(%16 : memref<!tpu.dma_semaphore, #tpu.memory_space<semaphore_mem>>)
    }
    %c16_i32_0 = arith.constant 16 : i32
    %c0_i32_1 = arith.constant 0 : i32
    %c16_i32_2 = arith.constant 16 : i32
    %1 = arith.addi %c0_i32_1, %c16_i32_2 : i32
    %c1_i32_3 = arith.constant 1 : i32
    scf.for %arg7 = %c0_i32_1 to %1 step %c1_i32_3  : i32 {
      %c1_i32_11 = arith.constant 1 : i32
      %8 = arith.muli %arg7, %c1_i32_11 : i32
      %c0_i32_12 = arith.constant 0 : i32
      %9 = arith.addi %c0_i32_12, %8 : i32
      %c0_i32_13 = arith.constant 0 : i32
      %c0_i32_14 = arith.constant 0 : i32
      %10 = tpu.memref_slice %arg2[%c0_i32_13, %c0_i32_14] : memref<512x128xf32, #tpu.memory_space<any>> -> memref<1x128xf32, #tpu.memory_space<any>>
      %c0_i32_15 = arith.constant 0 : i32
      %11 = tpu.memref_slice %arg5[%9, %c0_i32_15] : memref<16x128xf32, #tpu.memory_space<vmem>> -> memref<1x128xf32, #tpu.memory_space<vmem>>
      %12 = tpu.memref_slice %arg6[%9] : memref<16x!tpu.dma_semaphore, #tpu.memory_space<semaphore_mem>> -> memref<1x!tpu.dma_semaphore, #tpu.memory_space<semaphore_mem>>
      %13 = tpu.memref_squeeze %12 : memref<1x!tpu.dma_semaphore, #tpu.memory_space<semaphore_mem>> -> memref<!tpu.dma_semaphore, #tpu.memory_space<semaphore_mem>>
      tpu.wait_dma2 semaphore(%13 : memref<!tpu.dma_semaphore, #tpu.memory_space<semaphore_mem>>) src(%10 : memref<1x128xf32, #tpu.memory_space<any>>) dst(%11 : memref<1x128xf32, #tpu.memory_space<vmem>>)
    }
    %c16_i32_4 = arith.constant 16 : i32
    %c0 = arith.constant 0 : index
    %c0_5 = arith.constant 0 : index
    %2 = vector.load %arg5[%c0, %c0_5] : memref<16x128xf32, #tpu.memory_space<vmem>>, vector<16x128xf32>
    %c0_6 = arith.constant 0 : index
    %c0_7 = arith.constant 0 : index
    %3 = vector.load %arg3[%c0_6, %c0_7] : memref<16x128xf32, #tpu.memory_space<vmem>>, vector<16x128xf32>
    %4 = arith.addf %2, %3 : vector<16x128xf32>
    %c0_8 = arith.constant 0 : index
    %c0_9 = arith.constant 0 : index
    %c0_10 = arith.constant 0 : index
    %5 = vector.load %arg4[%c0_8, %c0_9, %c0_10] : memref<1x16x128xf32, #tpu.memory_space<vmem>>, vector<1x16x128xf32>
    %6 = vector.shape_cast %5 : vector<1x16x128xf32> to vector<16x128xf32>
    %7 = vector.shape_cast %4 : vector<16x128xf32> to vector<1x16x128xf32>
    tpu.vector_store %arg4[%c0_8, %c0_9, %c0_10], %7 {strides = array<i32>} : memref<1x16x128xf32, #tpu.memory_space<vmem>>, vector<1x16x128xf32>,
    return
  }
  func.func @transform_1(%arg0: i32, %arg1: memref<2x16xi32, #tpu.memory_space<smem>>) -> (i32, i32) {
    %c0_i32 = arith.constant 0 : i32
    %c0_i32_0 = arith.constant 0 : i32
    %c0_i32_1 = arith.constant 0 : i32
    return %c0_i32, %c0_i32_0 : i32, i32
  }
  func.func @transform_2(%arg0: i32, %arg1: memref<2x16xi32, #tpu.memory_space<smem>>) -> (i32, i32, i32) {
    %c0_i32 = arith.constant 0 : i32
    %c0_i32_0 = arith.constant 0 : i32
    %c0_i32_1 = arith.constant 0 : i32
    return %arg0, %c0_i32, %c0_i32_0 : i32, i32, i32
  }
}

</mosaic_0001>

<bundles_post_ra>
// kernel: tpu_custom_call.1
= control target key start
LH: loop header
LB: loop body
LE: loop exit
PB: predicated region body
PF: predicated region fallthrough
CT: control target
= control target key end

     0   :  { %s820_s0 = inlined_call_operand.hbm [shape: s32[2,16], index: 0, kind: input, shape index: {}]   ;;  %s821_s1 = inlined_call_operand.hbm [shape: f32[512,128], index: 1, kind: input, shape index: {}]   ;;  %s822_s2 = inlined_call_operand.hbm [shape: f32[16,128], index: 2, kind: input, shape index: {}]   ;;  %s823_s3 = inlined_call_operand.hbm [shape: f32[2,16,128], index: 3, kind: output, shape index: {}]  }
   0x1   :  { %828 = sst [smem:[#allocation18_spill]] %s822_s2  ;;  %s466_s14 = scalar_lea.hbm %s820_s0, 32 }
   0x2   :  { %p467_p0 = scmp.ne.s32.totalorder %s820_s0, %s466_s14  ;;  %p470_p1 = scmp.lt.u32.totalorder %s466_s14, %s820_s0 }
   0x4   :  { %p472_p2 = pnand %p470_p1, %p467_p0 }
   0x6   :  { %475 = shalt.err (!%p472_p2)  }
   0x7   :  { %s616_s19 = smov [#allocation5]  }
   0x8   :  { %9 = dma.hbm_to_smem %s820_s0, 32, %s616_s19, [#allocation4] }
   0x9   :  { %580 = dma.done.wait [#allocation4], 32 }
   0xa   :  { %581 = vsyncadd [#allocation4], 4294967264 }
   0xb   :  { %11 = sfence }
   0xc   :  { %12 = vsyncpa [#allocation7], 0 }
   0xd   :  { %13 = vsyncpa [#allocation8], 0 }
   0xe   :  { %15 = vsyncpa [#allocation8 + $0x1], 0  ;;  %s656_s22 = smov 0   ;;  %s658_s23 = smov 0  }
   0xf   :  { %s660_s24 = smov 0   ;;  %s662_s25 = smov 0  }
  0x10 LB: > { %s677_s0 = sadd.s32 4294967295, %s606_s25   ;;  %s365_s26 = sadd.s32 4294967294, %s606_s25   ;;  %s606_s25 = sphi %s662_s25, %s843_s25   ;;  %s602_s24 = sphi %s660_s24, %s842_s24   ;;  %s598_s23 = sphi %s658_s23, %s841_s23   ;;  %s594_s22 = sphi %s656_s22, %s840_s22  }
  0x11   : > { %s681_s27 = sadd.s32 1, %s606_s25   ;;  %s49_s28 = sadd.s32 1, %s602_s24 }
  0x12   : > { %s46_s29 = ssub.s32 %s606_s25, %s681_s27  ;;  %p59_p3 = scmp.ne.s32.totalorder %s602_s24, %s598_s23 }
  0x13   : > { %p47_p4 = scmp.eq.s32.totalorder %s46_s29, 0  ;;  %p60_p5 = scmp.eq.s32.totalorder %s677_s0, 1 }
  0x14   : > { %p65_p6 = scmp.ne.s32.totalorder %s598_s23, %s594_s22  ;;  %p66_p7 = scmp.eq.s32.totalorder %s365_s26, 1 }
  0x15   : > { %s692_s30 = scalar_select %p47_p4, %s602_s24, %s49_s28  }
  0x16   : > { %p694_p8 = por %p60_p5, %p59_p3  ;;  %p698_p9 = por %p66_p7, %p65_p6 }
  0x17   : > { %p366_p10 = scmp.ge.s32.totalorder %s606_s25, 1  ;;  %p73_p11 = scmp.lt.s32.totalorder %s606_s25, 3 }
  0x18   : > { %s829_s4 = scalar_select %p694_p8, 1, 0 }
  0x19   : > { %s830_s5 = scalar_select %p698_p9, 1, 0 }
  0x1a   : > { %p824_p12 = scmp.eq.s32.totalorder %s677_s0, 0  ;;  %p705_p13 = pnand %p366_p10, %p73_p11 }
  0x1b   : > { %s617_s7 = smov [#allocation6]   ;;  %s833_s2 = sld [smem:[#allocation18_spill]] }
  0x1c   : > { %s831_s6 = scalar_select %p705_p13, 1, 0 }
  0x1d   : > { %s85_s8 = sshll.u32 %s617_s7, 4  ;;  %p401_p0 = pneg %p705_p13  ;;  %s86_s8 = int_to_ptr.vmem [resolvable:$true] %s85_s8 }
  0x1f   : > { %p713_p1 = pnand %p824_p12, %p401_p0 }
  0x21   : > { %s476_s12 = scalar_lea.hbm %s833_s2, 256  ;;  %p478_p3 = pneg %p713_p1 }
  0x22   : > { %p477_p2 = scmp.ne.s32.totalorder %s833_s2, %s476_s12  ;;  %p483_p6 = scmp.lt.u32.totalorder %s476_s12, %s833_s2 }
  0x24   : > { %p479_p4 = pnand %p478_p3, %p477_p2 }
  0x26   : > { %p480_p5 = pneg %p479_p4 }
  0x28   : > { %p485_p7 = pnand %p483_p6, %p480_p5 }
  0x2a   : > { %488 = shalt.err (!%p485_p7)
}
  0x2b   : > { %s489_s17 = scalar_lea.vmem %s86_s8, 256  ;;  %p497_p12 = scmp.lt.s32.totalorder %s86_s8, %s86_s8 }
  0x2c   : > { %p490_p10 = scmp.ne.s32.totalorder %s86_s8, %s489_s17  ;;  %p498_p9 = scmp.lt.s32.totalorder %s489_s17, %s489_s17 }
  0x2e   : > { %p492_p11 = pnand %p490_p10, %p478_p3  ;;  %p499_p8 = por %p498_p9, %p497_p12 }
  0x30   : > { %p493_p0 = pneg %p492_p11 }
  0x32   : > { %p500_p13 = pnand %p499_p8, %p493_p0 }
  0x34   : > { %503 = shalt.err (!%p500_p13)
}
  0x35   : > { %s618_s18 = smov 128   ;;  %s619_s19 = smov 8  }
  0x36   : > { %404 = dma.hbm_to_vmem [thread:$0]  (!%p713_p1), %s833_s2, 256, %s86_s8, [#allocation7], %s618_s18, %s618_s18, %s619_s19  }
  0x37   : > { %p834_p2 = scmp.ne.s32.totalorder %s831_s6, 0 }
  0x38   : > { %p835_p4 = scmp.eq.s32.totalorder (!%p834_p2), %s677_s0, 0 }
  0x39   : > { %101 = sbr.rel (%p834_p2) target bundleno = 142 (0x8e), region = 24 }
  0x40   : > { %583 = dma.done.wait (%p835_p4), [#allocation7], 256   ;;  %p836_p3 = pmov %p835_p4 }
  0x41   : > { %s827_s26 = sand.u32 1, %s598_s23   ;;  %s744_s7 = smov 0  }
  0x42   : > { %585 = vsyncadd (%p836_p3), [#allocation7], 4294967040  ;;  %s370_s28 = sshll.u32 %s827_s26, 4 }
  0x43   : > { %s742_s29 = scalar_lea.vmem [#allocation9], %s370_s28 }
  0x44 LB: >> { %s122_s6 = sshra.s32 %s610_s7, 7  ;;  %s127_s8 = sand.u32 127, %s610_s7  ;;  %s610_s7 = sphi %s744_s7, %s121_s7  }
  0x45   : >> { %s124_s9 = sadd.s32 %s677_s0, %s122_s6  ;;  %s132_s13 = scalar_lea.vmem [#allocation2], %s610_s7 }
  0x46   : >> { %s371_s10 = sshll.u32 %s124_s9, 7  ;;  %s141_s14 = sshll.u32 %s132_s13, 4  ;;  %s142_s14 = int_to_ptr.vmem [resolvable:$true] %s141_s14 }
  0x47   : >> { %s128_s11 = sadd.s32 %s371_s10, %s127_s8  ;;  %s133_s19 = scalar_lea.sflag [#allocation3], %s610_s7 }
  0x48   : >> { %s129_s12 = sld [smem:[#allocation5 + %s128_s11]]  ;;  %s506_s26 = scalar_lea.hbm %s821_s1, 8192 }
  0x4e   : >> { %s372_s15 = sshll.u32 %s129_s12, 4 }
  0x4f   : >> { %s131_s18 = scalar_lea.hbm %s821_s1, %s372_s15 }
  0x50   : >> { %s504_s20 = scalar_lea.hbm %s131_s18, 16  ;;  %p507_p9 = scmp.lt.u32.totalorder %s131_s18, %s821_s1 }
  0x51   : >> { %p505_p8 = scmp.ne.s32.totalorder %s131_s18, %s504_s20  ;;  %p508_p12 = scmp.lt.u32.totalorder %s506_s26, %s504_s20 }
  0x52   : >> { %p510_p1 = scmp.lt.u32.totalorder %s504_s20, %s131_s18 }
  0x53   : >> { %p509_p13 = por %p508_p12, %p507_p9 }
  0x55   : >> { %p511_p5 = por %p510_p1, %p509_p13 }
  0x57   : >> { %p512_p6 = pnand %p511_p5, %p505_p8 }
  0x59   : >> { %515 = shalt.err (!%p512_p6)  }
  0x5a   : >> { %s516_s8 = scalar_lea.vmem %s142_s14, 16  ;;  %s620_s9 = smov [#allocation2]  }
  0x5b   : >> { %p517_p7 = scmp.ne.s32.totalorder %s142_s14, %s516_s8  ;;  %s518_s10 = sshll.u32 %s620_s9, 4  ;;  %s519_s10 = int_to_ptr.vmem [resolvable:$false] %s518_s10 }
  0x5c   : >> { %s520_s11 = scalar_lea.vmem %s519_s10, 256  ;;  %p521_p10 = scmp.lt.s32.totalorder %s142_s14, %s519_s10 }
  0x5d   : >> { %p522_p11 = scmp.lt.s32.totalorder %s520_s11, %s516_s8 }
  0x5f   : >> { %p523_p0 = por %p522_p11, %p521_p10 }
  0x61   : >> { %p524_p2 = pnand %p523_p0, %p517_p7 }
  0x63   : >> { %527 = shalt.err (!%p524_p2)  }
  0x64   : >> { %144 = dma.hbm_to_vmem [thread:$0]  %s131_s18, 16, %s142_s14, %s133_s19 }
  0x65   : >> { %s121_s7 = sadd.s32 1, %s610_s7  }
  0x66   : >> { %p118_p4 = scmp.ge.s32.totalorder %s121_s7, 16  }
  0x67   : > { %s612_s2 = smov (%p118_p4), 0  }
  0x68   : > { %120 = sbr.rel (!%p118_p4) target bundleno = 68 (0x44), region = 98 }
  0x6f LB: >> { %s151_s26 = scalar_lea.sflag [#allocation3], %s614_s2  ;;  %s614_s2 = sphi %s612_s2, %s150_s2  }
  0x70   : >> { %586 = dma.done.wait %s151_s26, 16 }
  0x71   : >> { %587 = vsyncadd %s151_s26, 4294967280  ;;  %s150_s2 = sadd.s32 1, %s614_s2  }
  0x72   : >> { %p147_p3 = scmp.ge.s32.totalorder %s150_s2, 16  }
  0x73   : > { %v155_v0 = vld [vmem:[#allocation2] sm:$0xff] (%p147_p3)  ;;  %v157_v1 = vld [vmem:[#allocation6] sm:$0xff] (%p147_p3)  ;;  %v156_v2 = vld [vmem:[#allocation2 + $0x8] sm:$0xff] (%p147_p3)  ;;  %s394_s7 = sshll.u32 (%p147_p3), %s677_s0, 8  ;;  %s177_s15 = sshll.u32 (%p147_p3), %s742_s29, 4  ;;  %s773_s15 = int_to_ptr.vmem [resolvable:$true] %s177_s15 }
  0x74   : > { %149 = sbr.rel (!%p147_p3) target bundleno = 111 (0x6f), region = 109  ;;  %v159_v3 = vadd.f32 (%p147_p3), %v157_v1, %v155_v0  ;;  %v158_v4 = vld [vmem:[#allocation6 + $0x8] sm:$0xff] (%p147_p3)  ;;  %s770_s14 = scalar_lea.hbm (%p147_p3), %s823_s3, %s394_s7 }
  0x75   : > { %v160_v5 = vadd.f32 (%p147_p3), %v158_v4, %v156_v2  ;;  %s837_s16 = sand.u32 (%p147_p3), 1, %s598_s23   ;;  %s528_s0 = scalar_lea.vmem (%p147_p3), %s773_s15, 256 }
  0x76   : > { %161 = vst [vmem:[%s742_s29] sm:$0xff] (%p147_p3), %v159_v3  ;;  %s779_s17 = scalar_lea.sflag (%p147_p3), [#allocation8], %s837_s16  ;;  %p529_p8 = scmp.ne.s32.totalorder (%p147_p3), %s773_s15, %s528_s0 }
  0x77   : > { %162 = vst [vmem:[%s742_s29 + $0x8] sm:$0xff] (%p147_p3), %v160_v5  ;;  %p838_p9 = scmp.ne.s32.totalorder (%p147_p3), %s829_s4, 0  ;;  %s621_s18 = smov (%p147_p3), [#allocation9]  }
  0x78   : > { %s532_s19 = sshll.u32 (%p147_p3), %s621_s18, 4  ;;  %s533_s19 = int_to_ptr.vmem [resolvable:$false] %s532_s19 }
  0x79   : > { %p530_p12 = pnand (%p147_p3), %p529_p8, %p838_p9  ;;  %s534_s20 = scalar_lea.vmem (%p147_p3), %s533_s19, 512 }
  0x7a   : > { %p535_p1 = scmp.lt.s32.totalorder (%p147_p3), %s773_s15, %s533_s19  ;;  %p536_p5 = scmp.lt.s32.totalorder (%p147_p3), %s534_s20, %s528_s0 }
  0x7b   : > { %p531_p13 = pneg %p530_p12 }
  0x7c   : > { %p537_p6 = por %p536_p5, %p535_p1 }
  0x7e   : > { %p538_p7 = pnand %p537_p6, %p531_p13 }
  0x80   : > { %541 = shalt.err (!%p538_p7)
}
  0x81   : > { %s542_s29 = scalar_lea.hbm %s770_s14, 256  ;;  %s546_s6 = scalar_lea.hbm %s823_s3, 512 }
  0x82   : > { %p543_p10 = scmp.ne.s32.totalorder %s770_s14, %s542_s29  ;;  %p547_p2 = scmp.lt.u32.totalorder %s770_s14, %s823_s3 }
  0x83   : > { %p548_p4 = scmp.lt.u32.totalorder %s546_s6, %s542_s29  ;;  %p550_p8 = scmp.lt.u32.totalorder %s542_s29, %s770_s14 }
  0x84   : > { %p544_p11 = pnand %p543_p10, %p838_p9 }
  0x85   : > { %p549_p3 = por %p548_p4, %p547_p2 }
  0x86   : > { %p545_p0 = pneg %p544_p11 }
  0x87   : > { %p551_p12 = por %p550_p8, %p549_p3 }
  0x89   : > { %p552_p13 = pnand %p551_p12, %p545_p0 }
  0x8b   : > { %555 = shalt.err (!%p552_p13)
}
  0x8c   : > { %s622_s10 = smov 128   ;;  %s623_s11 = smov 8  }
  0x8d   : > { %399 = dma.vmem_to_hbm [thread:$0]  (%p838_p9), %s773_s15, 256, %s770_s14, %s779_s17, %s622_s10, %s622_s10, %s623_s11  }
  0x8e PF: > { %p411_p1 = scmp.ge.s32.totalorder %s606_s25, 2  ;;  %s192_s2 = sand.u32 1, %s594_s22  }
  0x8f   : > { %p839_p5 = scmp.ne.s32.totalorder %s830_s5, 0  ;;  %s193_s26 = scalar_lea.sflag [#allocation8], %s192_s2 }
  0x91   : > { %p406_p6 = pnand %p411_p1, %p839_p5 }
  0x93   : > { %589 = dma.done.wait (!%p406_p6), %s193_s26, 256  }
  0x94   : > { %591 = vsyncadd (!%p406_p6), %s193_s26, 4294967040  ;;  %p18_p7 = scmp.ge.s32.totalorder %s681_s27, 4   ;;  %s840_s22 = smov %s598_s23 }
  0x95   : > { %s841_s23 = smov %s602_s24  ;;  %s842_s24 = smov %s692_s30 }
  0x96   : > { %s843_s25 = smov %s681_s27  ;;  %20 = sbr.rel (!%p18_p7) target bundleno = 16 (0x10), region = 120 }
  0x9d   :  { %198 = vsyncpa [#allocation7], 1 }
  0x9e   :  { %200 = vsyncpa [#allocation7 + $0x1], 1 }
  0x9f   :  { %201 = vsyncpa [#allocation8], 1 }
  0xa0   :  { %203 = vsyncpa [#allocation8 + $0x1], 1 }
  0xa1   :  { %204 = vsyncmov [#allocation3] }
  0xa4   :  { %s205_s25 = vpop.sfrf %204 }
  0xa5   :  { %p378_p9 = scmp.ne.s32.totalorder %s205_s25, 0 }
  0xa7   :  { %209 = shalt.err (%p378_p9)  }
  0xa8   :  { %211 = vsyncmov [#allocation3 + $0x1] }
  0xab   :  { %s212_s4 = vpop.sfrf %211 }
  0xac   :  { %p379_p10 = scmp.ne.s32.totalorder %s212_s4, 0 }
  0xae   :  { %216 = shalt.err (%p379_p10)  }
  0xaf   :  { %218 = vsyncmov [#allocation3 + $0x2] }
  0xb2   :  { %s219_s5 = vpop.sfrf %218 }
  0xb3   :  { %p380_p11 = scmp.ne.s32.totalorder %s219_s5, 0 }
  0xb5   :  { %223 = shalt.err (%p380_p11)  }
  0xb6   :  { %225 = vsyncmov [#allocation3 + $0x3] }
  0xb9   :  { %s226_s30 = vpop.sfrf %225 }
  0xba   :  { %p381_p0 = scmp.ne.s32.totalorder %s226_s30, 0 }
  0xbc   :  { %230 = shalt.err (%p381_p0)  }
  0xbd   :  { %232 = vsyncmov [#allocation3 + $0x4] }
  0xc0   :  { %s233_s1 = vpop.sfrf %232 }
  0xc1   :  { %p382_p2 = scmp.ne.s32.totalorder %s233_s1, 0 }
  0xc3   :  { %237 = shalt.err (%p382_p2)  }
  0xc4   :  { %239 = vsyncmov [#allocation3 + $0x5] }
  0xc7   :  { %s240_s3 = vpop.sfrf %239 }
  0xc8   :  { %p383_p4 = scmp.ne.s32.totalorder %s240_s3, 0 }
  0xca   :  { %244 = shalt.err (%p383_p4)  }
  0xcb   :  { %246 = vsyncmov [#allocation3 + $0x6] }
  0xce   :  { %s247_s22 = vpop.sfrf %246 }
  0xcf   :  { %p384_p3 = scmp.ne.s32.totalorder %s247_s22, 0 }
  0xd1   :  { %251 = shalt.err (%p384_p3)  }
  0xd2   :  { %253 = vsyncmov [#allocation3 + $0x7] }
  0xd5   :  { %s254_s23 = vpop.sfrf %253 }
  0xd6   :  { %p385_p8 = scmp.ne.s32.totalorder %s254_s23, 0 }
  0xd8   :  { %258 = shalt.err (%p385_p8)  }
  0xd9   :  { %260 = vsyncmov [#allocation3 + $0x8] }
  0xdc   :  { %s261_s24 = vpop.sfrf %260 }
  0xdd   :  { %p386_p12 = scmp.ne.s32.totalorder %s261_s24, 0 }
  0xdf   :  { %265 = shalt.err (%p386_p12)  }
  0xe0   :  { %267 = vsyncmov [#allocation3 + $0x9] }
  0xe3   :  { %s268_s27 = vpop.sfrf %267 }
  0xe4   :  { %p387_p13 = scmp.ne.s32.totalorder %s268_s27, 0 }
  0xe6   :  { %272 = shalt.err (%p387_p13)  }
  0xe7   :  { %274 = vsyncmov [#allocation3 + $0xa] }
  0xea   :  { %s275_s7 = vpop.sfrf %274 }
  0xeb   :  { %p388_p1 = scmp.ne.s32.totalorder %s275_s7, 0 }
  0xed   :  { %279 = shalt.err (%p388_p1)  }
  0xee   :  { %281 = vsyncmov [#allocation3 + $0xb] }
  0xf1   :  { %s282_s12 = vpop.sfrf %281 }
  0xf2   :  { %p389_p5 = scmp.ne.s32.totalorder %s282_s12, 0 }
  0xf4   :  { %286 = shalt.err (%p389_p5)  }
  0xf5   :  { %288 = vsyncmov [#allocation3 + $0xc] }
  0xf8   :  { %s289_s13 = vpop.sfrf %288 }
  0xf9   :  { %p390_p6 = scmp.ne.s32.totalorder %s289_s13, 0 }
  0xfb   :  { %293 = shalt.err (%p390_p6)  }
  0xfc   :  { %295 = vsyncmov [#allocation3 + $0xd] }
  0xff   :  { %s296_s14 = vpop.sfrf %295 }
 0x100   :  { %p391_p7 = scmp.ne.s32.totalorder %s296_s14, 0 }
 0x102   :  { %300 = shalt.err (%p391_p7)  }
 0x103   :  { %302 = vsyncmov [#allocation3 + $0xe] }
 0x106   :  { %s303_s15 = vpop.sfrf %302 }
 0x107   :  { %p392_p9 = scmp.ne.s32.totalorder %s303_s15, 0 }
 0x109   :  { %307 = shalt.err (%p392_p9)  }
 0x10a   :  { %309 = vsyncmov [#allocation3 + $0xf] }
 0x10d   :  { %s310_s16 = vpop.sfrf %309 }
 0x10e   :  { %p393_p10 = scmp.ne.s32.totalorder %s310_s16, 0 }
 0x110   :  { %314 = shalt.err (%p393_p10)  }

</bundles_post_ra>
